<compile_context>
chip_gen: v7x
topology: tpu7x:2x2x1
jax: 0.10.0
libtpu: 0.0.40
codegen_flags: <defaults>
</compile_context>

<pallas_src>
import jax
import jax.numpy as jnp
from jax.experimental import pallas as pl
from jax.experimental.pallas import tpu as pltpu

HIDDEN = 16


def _round_up(x: int, m: int) -> int:
    return ((x + m - 1) // m) * m


def critic_kernel(x_ref, w1_ref, b1_ref, w2_ref, b2_ref, w3_ref, b3_ref, o_ref):
    cdt = w1_ref.dtype                                   # compute/storage dtype (f32 or bf16)
    x = x_ref[...]                                       # (S+A, TB), batch on lanes

    # fc1 + relu (single dot on the fused [state; action] slab)
    h1 = jnp.dot(w1_ref[...], x, preferred_element_type=jnp.float32) + b1_ref[...]
    h1 = jnp.maximum(h1, 0.0)                            # (16, TB), f32

    # fc2 + relu
    h2 = jnp.dot(w2_ref[...], h1.astype(cdt),
                 preferred_element_type=jnp.float32) + b2_ref[...]
    h2 = jnp.maximum(h2, 0.0)                            # (16, TB), f32

    # fc3
    q = jnp.dot(w3_ref[...], h2.astype(cdt),
                preferred_element_type=jnp.float32) + b3_ref[...]
    o_ref[...] = q.astype(o_ref.dtype)                   # (1, TB) lane-dense store


def critic_forward(state, action, params, *, block_b=128 * 1024,
                   input_dtype=jnp.float32, feature_major=False):
    """TD3 Critic forward.

    state:  (B, state_dim)  [or (state_dim, B) if feature_major=True]
    action: (B, action_dim) [or (action_dim, B) if feature_major=True]
    returns (B, 1) float32 Q-values.
    """
    w1, b1, w2, b2, w3, b3 = params    # PyTorch layout: w (out, in), b (out,)

    if feature_major:
        S, B = state.shape
        A = action.shape[0]
    else:
        B, S = state.shape
        A = action.shape[1]

    # Tile policy: number of tiles first, then the smallest lane-aligned tile
    # that covers them -> pad waste bounded to <128 batch rows per tile.
    n_tiles = pl.cdiv(B, block_b)
    tb = _round_up(-(-B // n_tiles), 128)
    Bp = n_tiles * tb

    cdt = jnp.dtype(input_dtype)

    # Single staging pass: one (S+A, Bp) feature-major slab (cast/T/concat/pad
    # fuse into one XLA op). feature_major inputs skip the transpose entirely.
    if feature_major:
        x_t = jnp.concatenate([state.astype(cdt), action.astype(cdt)], axis=0)
    else:
        x_t = jnp.concatenate([state.astype(cdt), action.astype(cdt)], axis=1).T
    x_t = jnp.pad(x_t, ((0, 0), (0, Bp - B)))             # (S+A, Bp)

    # Parameters: weights in compute dtype, biases as f32 (out, 1) columns.
    w1c = w1.astype(cdt)                                   # (16, S+A)
    w2c = w2.astype(cdt)                                   # (16, 16)
    w3c = w3.astype(cdt)                                   # (1, 16)
    b1c = b1.reshape(HIDDEN, 1).astype(jnp.float32)
    b2c = b2.reshape(HIDDEN, 1).astype(jnp.float32)
    b3c = b3.reshape(1, 1).astype(jnp.float32)

    const = lambda i: (0, 0)   # params: DMA'd once, VMEM-resident across grid steps

    out = pl.pallas_call(
        critic_kernel,
        out_shape=jax.ShapeDtypeStruct((1, Bp), jnp.float32),
        grid_spec=pltpu.PrefetchScalarGridSpec(
            num_scalar_prefetch=0,
            grid=(n_tiles,),
            in_specs=[
                pl.BlockSpec((S + A, tb), lambda i: (0, i)),   # fused input slab
                pl.BlockSpec((HIDDEN, S + A), const),          # w1
                pl.BlockSpec((HIDDEN, 1), const),              # b1
                pl.BlockSpec((HIDDEN, HIDDEN), const),         # w2
                pl.BlockSpec((HIDDEN, 1), const),              # b2
                pl.BlockSpec((1, HIDDEN), const),              # w3
                pl.BlockSpec((1, 1), const),                   # b3
            ],
            out_specs=pl.BlockSpec((1, tb), lambda i: (0, i)),
        ),
        compiler_params=pltpu.CompilerParams(
            dimension_semantics=("parallel",),     # v7x: shard batch tiles over 2 TCs
            vmem_limit_bytes=32 * 1024 * 1024,     # tb=128K f32 double-buffered ~10.5 MiB
        ),
    )(x_t, w1c, b1c, w2c, b2c, w3c, b3c)

    return out[:, :B].T                                    # (B, 1)


def init_params(key, state_dim, action_dim):
    """nn.Linear-style init, PyTorch storage layout: w (out, in), b (out,)."""
    def linear(k, fan_in, fan_out):
        kw, kb = jax.random.split(k)
        bound = 1.0 / jnp.sqrt(fan_in)
        w = jax.random.uniform(kw, (fan_out, fan_in), jnp.float32, -bound, bound)
        b = jax.random.uniform(kb, (fan_out,), jnp.float32, -bound, bound)
        return w, b

    k1, k2, k3 = jax.random.split(key, 3)
    w1, b1 = linear(k1, state_dim + action_dim, HIDDEN)
    w2, b2 = linear(k2, HIDDEN, HIDDEN)
    w3, b3 = linear(k3, HIDDEN, 1)
    return (w1, b1, w2, b2, w3, b3)


def critic_ref(state, action, params):
    """Pure-JAX reference (matches PyTorch Critic.forward)."""
    w1, b1, w2, b2, w3, b3 = params
    x = jnp.concatenate([state, action], axis=1)
    h1 = jnp.maximum(x @ w1.T + b1, 0.0)
    h2 = jnp.maximum(h1 @ w2.T + b2, 0.0)
    return h2 @ w3.T + b3


if __name__ == "__main__":
    state_dim = 8
    action_dim = 1
    batch = 4

    key = jax.random.PRNGKey(0)
    k_params, k_state, k_action = jax.random.split(key, 3)

    params = init_params(k_params, state_dim, action_dim)
    state = jax.random.normal(k_state, (batch, state_dim), jnp.float32)
    action = jax.random.normal(k_action, (batch, action_dim), jnp.float32)

    # 1) Small batch, f32 path (exact vs reference).
    q = critic_forward(state, action, params)
    jax.block_until_ready(q)
    q_ref = critic_ref(state, action, params)
    assert q.shape == (batch, 1), q.shape
    assert jnp.allclose(q, q_ref, atol=1e-5, rtol=1e-5), (q, q_ref)

    # 2) Multi-tile grid + improved padding policy (B=300, block_b=128 -> 3 tiles of 128).
    big_batch = 300
    ks2, ka2 = jax.random.split(jax.random.PRNGKey(1))
    state2 = jax.random.normal(ks2, (big_batch, state_dim), jnp.float32)
    action2 = jax.random.normal(ka2, (big_batch, action_dim), jnp.float32)
    q2 = critic_forward(state2, action2, params, block_b=128)
    jax.block_until_ready(q2)
    q2_ref = critic_ref(state2, action2, params)
    assert q2.shape == (big_batch, 1), q2.shape
    assert jnp.allclose(q2, q2_ref, atol=1e-5, rtol=1e-5)

    # 3) feature-major fast path (skips the wrapper transpose pass entirely).
    q3 = critic_forward(state2.T, action2.T, params, block_b=128, feature_major=True)
    jax.block_until_ready(q3)
    assert jnp.allclose(q3, q2_ref, atol=1e-5, rtol=1e-5)

    # 4) bf16-input path (halves HBM traffic; small numeric deviation expected).
    q4 = critic_forward(state2, action2, params, block_b=128,
                        input_dtype=jnp.bfloat16)
    jax.block_until_ready(q4)
    assert jnp.allclose(q4, q2_ref, atol=5e-2, rtol=5e-2)

    print("KERNEL_OK")
</pallas_src>

<mosaic_0001>
module attributes {stable_mosaic.version = 11 : i64} {
  func.func @critic_kernel(%arg0: i32, %arg1: memref<9x128xf32, #tpu.memory_space<vmem>>, %arg2: memref<16x9xf32, #tpu.memory_space<vmem>>, %arg3: memref<16x1xf32, #tpu.memory_space<vmem>>, %arg4: memref<16x16xf32, #tpu.memory_space<vmem>>, %arg5: memref<16x1xf32, #tpu.memory_space<vmem>>, %arg6: memref<1x16xf32, #tpu.memory_space<vmem>>, %arg7: memref<1x1xf32, #tpu.memory_space<vmem>>, %arg8: memref<1x128xf32, #tpu.memory_space<vmem>>) attributes {dimension_semantics = [#tpu.dimension_semantics<parallel>], iteration_bounds = array<i64: 1>, scalar_prefetch = 0 : i64, scratch_operands = 0 : i64, tpu.core_type = #tpu.core_type<tc>, window_params = [{transform_indices = @transform_0, window_bounds = array<i64: 9, 128>}, {pipeline_mode = #tpu.pipeline_mode<synchronous>, transform_indices = @transform_1, window_bounds = array<i64: 16, 9>}, {pipeline_mode = #tpu.pipeline_mode<synchronous>, transform_indices = @transform_2, window_bounds = array<i64: 16, 1>}, {pipeline_mode = #tpu.pipeline_mode<synchronous>, transform_indices = @transform_3, window_bounds = array<i64: 16, 16>}, {pipeline_mode = #tpu.pipeline_mode<synchronous>, transform_indices = @transform_4, window_bounds = array<i64: 16, 1>}, {pipeline_mode = #tpu.pipeline_mode<synchronous>, transform_indices = @transform_5, window_bounds = array<i64: 1, 16>}, {pipeline_mode = #tpu.pipeline_mode<synchronous>, transform_indices = @transform_6, window_bounds = array<i64: 1, 1>}, {transform_indices = @transform_7, window_bounds = array<i64: 1, 128>}]} {
    %c0 = arith.constant 0 : index
    %c0_0 = arith.constant 0 : index
    %0 = vector.load %arg1[%c0, %c0_0] : memref<9x128xf32, #tpu.memory_space<vmem>>, vector<9x128xf32>
    %c0_1 = arith.constant 0 : index
    %c0_2 = arith.constant 0 : index
    %1 = vector.load %arg2[%c0_1, %c0_2] : memref<16x9xf32, #tpu.memory_space<vmem>>, vector<16x9xf32>
    %cst = arith.constant dense<0.000000e+00> : vector<16x128xf32>
    %2 = tpu.matmul %1, %0, %cst {dimension_numbers = #tpu.dot_dimension_numbers<[1], [0], [0], [1], [0, 0, 1, 1], [], []>} : vector<16x9xf32>, vector<9x128xf32>, vector<16x128xf32> -> vector<16x128xf32>
    %c0_3 = arith.constant 0 : index
    %c0_4 = arith.constant 0 : index
    %3 = vector.load %arg3[%c0_3, %c0_4] : memref<16x1xf32, #tpu.memory_space<vmem>>, vector<16x1xf32>
    %4 = vector.broadcast %3 : vector<16x1xf32> to vector<16x128xf32>
    %5 = arith.addf %2, %4 : vector<16x128xf32>
    %cst_5 = arith.constant 0.000000e+00 : f32
    %6 = vector.broadcast %cst_5 : f32 to vector<16x128xf32>
    %7 = arith.maximumf %5, %6 : vector<16x128xf32>
    %c0_6 = arith.constant 0 : index
    %c0_7 = arith.constant 0 : index
    %8 = vector.load %arg4[%c0_6, %c0_7] : memref<16x16xf32, #tpu.memory_space<vmem>>, vector<16x16xf32>
    %cst_8 = arith.constant dense<0.000000e+00> : vector<16x128xf32>
    %9 = tpu.matmul %8, %7, %cst_8 {dimension_numbers = #tpu.dot_dimension_numbers<[1], [0], [0], [1], [0, 0, 1, 1], [], []>} : vector<16x16xf32>, vector<16x128xf32>, vector<16x128xf32> -> vector<16x128xf32>
    %c0_9 = arith.constant 0 : index
    %c0_10 = arith.constant 0 : index
    %10 = vector.load %arg5[%c0_9, %c0_10] : memref<16x1xf32, #tpu.memory_space<vmem>>, vector<16x1xf32>
    %11 = vector.broadcast %10 : vector<16x1xf32> to vector<16x128xf32>
    %12 = arith.addf %9, %11 : vector<16x128xf32>
    %cst_11 = arith.constant 0.000000e+00 : f32
    %13 = vector.broadcast %cst_11 : f32 to vector<16x128xf32>
    %14 = arith.maximumf %12, %13 : vector<16x128xf32>
    %c0_12 = arith.constant 0 : index
    %c0_13 = arith.constant 0 : index
    %15 = vector.load %arg6[%c0_12, %c0_13] : memref<1x16xf32, #tpu.memory_space<vmem>>, vector<1x16xf32>
    %cst_14 = arith.constant dense<0.000000e+00> : vector<1x128xf32>
    %16 = tpu.matmul %15, %14, %cst_14 {dimension_numbers = #tpu.dot_dimension_numbers<[1], [0], [0], [1], [0, 0, 1, 1], [], []>} : vector<1x16xf32>, vector<16x128xf32>, vector<1x128xf32> -> vector<1x128xf32>
    %c0_15 = arith.constant 0 : index
    %c0_16 = arith.constant 0 : index
    %17 = vector.load %arg7[%c0_15, %c0_16] : memref<1x1xf32, #tpu.memory_space<vmem>>, vector<1x1xf32>
    %18 = vector.broadcast %17 : vector<1x1xf32> to vector<1x128xf32>
    %19 = arith.addf %16, %18 : vector<1x128xf32>
    %c0_17 = arith.constant 0 : index
    %c0_18 = arith.constant 0 : index
    %20 = vector.load %arg8[%c0_17, %c0_18] : memref<1x128xf32, #tpu.memory_space<vmem>>, vector<1x128xf32>
    tpu.vector_store %arg8[%c0_17, %c0_18], %19 {strides = array<i32>} : memref<1x128xf32, #tpu.memory_space<vmem>>, vector<1x128xf32>,
    return
  }
  func.func @transform_0(%arg0: i32) -> (i32, i32) {
    %c0_i32 = arith.constant 0 : i32
    %c0_i32_0 = arith.constant 0 : i32
    return %c0_i32, %arg0 : i32, i32
  }
  func.func @transform_1(%arg0: i32) -> (i32, i32) {
    %c0_i32 = arith.constant 0 : i32
    %c0_i32_0 = arith.constant 0 : i32
    %c0_i32_1 = arith.constant 0 : i32
    return %c0_i32, %c0_i32_0 : i32, i32
  }
  func.func @transform_2(%arg0: i32) -> (i32, i32) {
    %c0_i32 = arith.constant 0 : i32
    %c0_i32_0 = arith.constant 0 : i32
    %c0_i32_1 = arith.constant 0 : i32
    return %c0_i32, %c0_i32_0 : i32, i32
  }
  func.func @transform_3(%arg0: i32) -> (i32, i32) {
    %c0_i32 = arith.constant 0 : i32
    %c0_i32_0 = arith.constant 0 : i32
    %c0_i32_1 = arith.constant 0 : i32
    return %c0_i32, %c0_i32_0 : i32, i32
  }
  func.func @transform_4(%arg0: i32) -> (i32, i32) {
    %c0_i32 = arith.constant 0 : i32
    %c0_i32_0 = arith.constant 0 : i32
    %c0_i32_1 = arith.constant 0 : i32
    return %c0_i32, %c0_i32_0 : i32, i32
  }
  func.func @transform_5(%arg0: i32) -> (i32, i32) {
    %c0_i32 = arith.constant 0 : i32
    %c0_i32_0 = arith.constant 0 : i32
    %c0_i32_1 = arith.constant 0 : i32
    return %c0_i32, %c0_i32_0 : i32, i32
  }
  func.func @transform_6(%arg0: i32) -> (i32, i32) {
    %c0_i32 = arith.constant 0 : i32
    %c0_i32_0 = arith.constant 0 : i32
    %c0_i32_1 = arith.constant 0 : i32
    return %c0_i32, %c0_i32_0 : i32, i32
  }
  func.func @transform_7(%arg0: i32) -> (i32, i32) {
    %c0_i32 = arith.constant 0 : i32
    %c0_i32_0 = arith.constant 0 : i32
    return %c0_i32, %arg0 : i32, i32
  }
}

</mosaic_0001>

<bundles_post_ra>
// kernel: tpu_custom_call.1
= control target key start
LH: loop header
LB: loop body
LE: loop exit
PB: predicated region body
PF: predicated region fallthrough
CT: control target
= control target key end

     0   :  { %s510_s0 = inlined_call_operand.vmem [shape: f32[9,128], index: 0, kind: input, shape index: {}]   ;;  %s511_s1 = inlined_call_operand.vmem [shape: f32[16,9], index: 1, kind: input, shape index: {}]   ;;  %s512_s2 = inlined_call_operand.vmem [shape: f32[16,1], index: 2, kind: input, shape index: {}]   ;;  %s513_s3 = inlined_call_operand.vmem [shape: f32[16,16], index: 3, kind: input, shape index: {}]   ;;  %s514_s4 = inlined_call_operand.vmem [shape: f32[16,1], index: 4, kind: input, shape index: {}]   ;;  %s515_s5 = inlined_call_operand.vmem [shape: f32[1,16], index: 5, kind: input, shape index: {}]   ;;  %s516_s6 = inlined_call_operand.<no memory space> [shape: f32[1,1], index: 6, kind: input, shape index: {}]   ;;  %s517_s7 = inlined_call_operand.hbm [shape: f32[1,128], index: 7, kind: output, shape index: {}]  }
   0x1   :  { %v12_v0 = vstv %s516_s6 }
   0x2   :  { %13 = vst [vmem:[#allocation2] sm:$0x1] %v12_v0 }
   0x3   :  { %v29_v1 = vld [vmem:[%s510_s0] sm:$0xff]  ;;  %v30_v2 = vld [vmem:[%s510_s0 + $0x8] sm:$0x1]  ;;  %vm52_vm0 = vcmask 1040384   ;;  %vm413_vm1 = vmmov 1   ;;  %vm45_vm3 = vcmask 72704  }
   0x4   :  { %v31_v3 = vld [vmem:[%s511_s1] sm:$0xff]  ;;  %v368_v4 = vpack.c.bf16 %v30_v2, %v29_v1  ;;  %vm369_vm2 = vmpackc.low %vm52_vm0, %vm413_vm1  ;;  %v414_v6 = vmov 0  }
   0x5   :  { %v33_v5 = vld [vmem:[%s512_s2] sm:$0xff]  ;;  %351 = vmatprep.mubr.msk.f32.mxu0 %vm45_vm3, %v31_v3  ;;  %387 = vset.pattern.permute.xlu0 %v414_v6 }
   0x6   :  { %14 = vsyncpa [#allocation4], 0  ;;  %370 = vmatprep.subr.msk.bf16.mxu0 %vm369_vm2, %v368_v4  ;;  %37 = vperm.xlu0 %387, %v33_v5   ;;  %v32_v7 = vld [vmem:[%s511_s1 + $0x8] sm:$0xff]  ;;  %v133_v10 = vld [vmem:[%s513_s3] sm:$0xff]  ;;  %vm147_vm4 = vcmask 130048   ;;  %v415_v23 = vmov 0.0|0.0   ;;  %v238_v35 = vlaneseq }
   0x7   :  { %373 = vmatpush3.bf16.msk.msra.mxu0 %vm369_vm2, %v368_v4  ;;  %v34_v8 = vld [vmem:[%s512_s2 + $0x8] sm:$0xff]  ;;  %388 = vset.pattern.permute.xlu1 %v414_v6  ;;  %v135_v11 = vld [vmem:[%s514_s4] sm:$0xff]  ;;  %vm416_vm5 = vmmov 0   ;;  %v417_v24 = vmov 0.0  }
   0x8   :  { %358 = vmatprep.mubr.msk.f32.mxu1 %vm147_vm4, %v133_v10  ;;  %139 = vperm.xlu1 %388, %v135_v11   ;;  %v136_v12 = vld [vmem:[%s514_s4 + $0x8] sm:$0xff]  ;;  %v231_v34 = vld [vmem:[%s515_s5] sm:$0x1]  ;;  %v239_v36 = vshrl.u32 %v238_v35, 7 }
   0x9   :  { %v232_v9 = vld [vmem:[#allocation2] sm:$0x1]  ;;  %v134_v22 = vld [vmem:[%s513_s3 + $0x8] sm:$0xff]  ;;  %378 = vmatprep.subr.bf16.mxu0 %v415_v23  ;;  %s418_s3 = smov [#allocation3]  }
   0xa   :  { %352 = vmatmul.mubr.msk.f32.vlgmr.msra.gmra.mrb[0].mxu0 %vm45_vm3, %v32_v7  ;;  %42 = vperm.xlu0 %387, %v34_v8   ;;  %v240_v37 = vsub.s32 0, %v239_v36  ;;  %s322_s20 = sshll.u32 %s418_s3, 4  ;;  %s323_s20 = int_to_ptr.vmem [resolvable:$true] %s322_s20 }
   0xb   :  { %365 = vmatprep.mubr.msk.f32.mxu0 %vm416_vm5, %v417_v24  ;;  %s389_s21 = scalar_lea.vmem %s323_s20, 16  ;;  %s393_s22 = scalar_lea.vmem %s323_s20, 32 }
   0xc   :  { %144 = vperm.xlu1 %388, %v136_v12   ;;  %p390_p0 = scmp.ne.s32.totalorder %s323_s20, %s389_s21  ;;  %p394_p1 = scmp.lt.s32.totalorder %s323_s20, %s323_s20 }
   0xd   :  { %p395_p2 = scmp.lt.s32.totalorder %s393_s22, %s389_s21 }
   0xe   :  { %235 = vperm.xlu0 %387, %v232_v9  }
   0xf   :  { %p396_p3 = por %p395_p2, %p394_p1 }
  0x11   :  { %p397_p4 = pnand %p396_p3, %p390_p0 }
  0x85   :  { %v38_v13 = vpop.permute.xlu0 %37 }
  0x87   :  { %v140_v25 = vpop.permute.xlu1 %139 }
  0x89   :  { %v43_v14 = vpop.permute.xlu0 %42 }
  0x8b   :  { %v145_v26 = vpop.permute.xlu1 %144 }
  0x8d   :  { %v236_v38 = vpop.permute.xlu0 %235 }
  0x8e   :  { %v241_v39 = vrot.slane %v236_v38, %v240_v37 }
  0xdd   :  { %v353_v15 = vpop.f32.mrb[0].mxu0 }
  0xde   :  { %v128_v16 = vadd.f32 %v353_v15, %v43_v14  ;;  %v122_v17 = vpop.f32.mrb[1].mxu0 }
  0xdf   :  { %v123_v18 = vadd.f32 %v122_v17, %v38_v13 }
  0xe0   :  { %v132_v19 = vmax.f32 %v128_v16, 0.0 }
  0xe1   :  { %v131_v20 = vmax.f32 %v123_v18, 0.0 }
  0xe3   :  { %v374_v21 = vpack.c.bf16 %v132_v19, %v131_v20 }
  0xe5   :  { %375 = vmatprep.subr.bf16.mxu1 %v374_v21 }
  0xe6   :  { %377 = vmatpush3.bf16.msra.mxu1 %v374_v21 }
  0xe9   :  { %359 = vmatmul.mubr.msk.f32.vlgmr.msra.gmra.mrb[0].mxu1 %vm147_vm4, %v134_v22 }
 0x1bc   :  { %v360_v27 = vpop.f32.mrb[0].mxu1 }
 0x1bd   :  { %v226_v28 = vadd.f32 %v360_v27, %v145_v26  ;;  %v220_v29 = vpop.f32.mrb[1].mxu1 }
 0x1be   :  { %v221_v30 = vadd.f32 %v220_v29, %v140_v25 }
 0x1bf   :  { %v230_v31 = vmax.f32 %v226_v28, 0.0 }
 0x1c0   :  { %v229_v32 = vmax.f32 %v221_v30, 0.0 }
 0x1c2   :  { %v379_v33 = vpack.c.bf16 %v230_v31, %v229_v32 }
 0x1c4   :  { %380 = vmatpush3.bf16.msra.mxu0 %v379_v33 }
 0x1c7   :  { %366 = vmatmul.mubr.msk.f32.vlgmr.msra.gmra.mrb[2].mxu0 %vm147_vm4, %v231_v34 }
 0x29a   :  { %v311_v40 = vpop.f32.mrb[2].mxu0 }
 0x29b   :  { %v312_v41 = vadd.f32 %v311_v40, %v241_v39  ;;  %v367_v42 = vpop.f32.mrb[3].mxu0 }
 0x29d   :  { %315 = vst [vmem:[#allocation3] sm:$0x1] %v312_v41 }
 0x29e   :  { %400 = shalt.err (!%p397_p4)
}
 0x29f   :  { %s401_s24 = scalar_lea.hbm %s517_s7, 16 }
 0x2a0   :  { %p402_p5 = scmp.ne.s32.totalorder %s517_s7, %s401_s24  ;;  %p405_p6 = scmp.lt.u32.totalorder %s401_s24, %s517_s7 }
 0x2a2   :  { %p407_p7 = pnand %p405_p6, %p402_p5 }
 0x2a4   :  { %410 = shalt.err (!%p407_p7)
}
 0x2a5   :  { %325 = dma.vmem_to_hbm [thread:$0]  %s323_s20, 16, %s517_s7, [#allocation4]  }
 0x2a6   :  { %411 = dma.done.wait [#allocation4], 16  }
 0x2a7   :  { %412 = vsyncadd [#allocation4], 4294967280 }
 0x2a8   :  { %329 = vsyncpa [#allocation4], 1 }

</bundles_post_ra>
